<compile_context>
chip_gen: v7x
topology: tpu7x:2x2x1
jax: 0.10.0
libtpu: 0.0.40
codegen_flags: <defaults>
</compile_context>

<pallas_src>
import functools

import jax
import jax.numpy as jnp
from jax.experimental import pallas as pl
from jax.experimental.pallas import tpu as pltpu

_MIB = 1024 * 1024


def _layer_norm(y, gamma, beta, eps=1e-5):
    mu = jnp.mean(y, axis=-1, keepdims=True)
    var = jnp.mean((y - mu) ** 2, axis=-1, keepdims=True)
    return (y - mu) * jax.lax.rsqrt(var + eps) * gamma + beta


def qkv_proj_kernel(x_ref, w_ref, b_ref, o_ref):
    # x_ref: (1, tr, D) bf16 ; w_ref: (D, 3*Dh) bf16 ; b_ref: (1, 3*Dh) f32
    y = jnp.dot(x_ref[0], w_ref[...], preferred_element_type=jnp.float32)
    y = y + b_ref[...]
    o_ref[0, :, :] = y.astype(o_ref.dtype)


def encoder_block_kernel(
    x_ref, q_ref, k_ref, v_ref,
    wo_ref, bo_ref, g1_ref, be1_ref, g2_ref, be2_ref,
    w1_ref, b1_ref, w2_ref, b2_ref,
    o_ref,
    *, n_heads, d_feature,
):
    f32, bf16 = jnp.float32, jnp.bfloat16

    x = x_ref[0]          # (tq, D)  f32 residual / query rows
    q = q_ref[0]          # (tq, Dh) bf16 (softmax scale already folded in)
    k = k_ref[0]          # (S, Dh)  bf16, projected once by kernel 1
    v = v_ref[0]          # (S, Dh)  bf16

    tq = q.shape[0]
    d_model = x.shape[-1]

    # 'qd,kd->qk': contract the feature dim of both operands directly on the
    # MXU -- no explicit K transpose.
    dn_qk = (((1,), (1,)), ((), ()))

    att = jnp.zeros((tq, d_model), f32)
    # Small static head loop (H = 4..8); O-projection accumulated per head so
    # no per-head concat is ever materialized.
    for h in range(n_heads):
        sl = slice(h * d_feature, (h + 1) * d_feature)
        s = jax.lax.dot_general(q[:, sl], k[:, sl], dn_qk,
                                preferred_element_type=f32)        # (tq, S) f32
        s = s - jnp.max(s, axis=-1, keepdims=True)                 # stable softmax
        p = jnp.exp(s)                                             # f32 exp (v5e-safe)
        # approx reciprocal runs on the EUP slot; ~1e-3 relative deviation from
        # exact softmax (documented, within the test tolerance).
        p = p * pl.reciprocal(jnp.sum(p, axis=-1, keepdims=True), approx=True)
        head = jnp.dot(p.astype(bf16), v[:, sl], preferred_element_type=f32)
        att = att + jnp.dot(head.astype(bf16), wo_ref[h],
                            preferred_element_type=f32)
    att = att + bo_ref[...]

    # residual 1: x + norm1(att)   (f32 residual path)
    x1 = x + _layer_norm(att, g1_ref[...], be1_ref[...])

    # position-wise feed-forward
    h1 = jnp.dot(x1.astype(bf16), w1_ref[...], preferred_element_type=f32) + b1_ref[...]
    h1 = jnp.maximum(h1, 0.0)
    pos = jnp.dot(h1.astype(bf16), w2_ref[...], preferred_element_type=f32) + b2_ref[...]

    # residual 2: x1 + norm2(pos)
    out = x1 + _layer_norm(pos, g2_ref[...], be2_ref[...])
    o_ref[0, :, :] = out.astype(o_ref.dtype)


def _vmem_limit_bytes():
    """Per-generation scoped VMEM budget (don't hardcode one number)."""
    try:
        phys = pltpu.get_tpu_info().vmem_capacity_bytes
    except Exception:
        return 64 * _MIB
    if phys <= 64 * _MIB:        # v7x-class: 64 MiB physical per TensorCore
        return 32 * _MIB
    return 96 * _MIB             # v5e / v6e: 128 MiB physical


def _const_index_map(nd):
    def idx(*_):
        return (0,) * nd
    return idx


def encoder_block(x, params, *, n_heads, d_feature, tq=None):
    B, S, D = x.shape
    Dh = n_heads * d_feature
    assert Dh == D, "n_heads * d_feature must equal d_model"
    assert D % 128 == 0, "d_model must be a multiple of 128 for lane-dense blocks"

    bf16, f32 = jnp.bfloat16, jnp.float32
    vmem_limit = _vmem_limit_bytes()

    # Query-row tile: large enough to fill the MXU M dim and amortize per-step
    # overhead; smaller cap on 64-MiB-VMEM chips (v7x).
    row_cap = 128 if vmem_limit <= 32 * _MIB else 256
    if tq is None:
        tq = S if S <= row_cap else row_cap
    assert S % tq == 0, "sequence length must be divisible by the query tile"
    assert tq % 8 == 0 or tq == S, "query tile should be a sublane multiple"
    tr = S if S <= 256 else 256            # row tile for the QKV projection
    assert S % tr == 0

    scale = 1.0 / (d_feature ** 0.5)
    # Fused QKV weight (one big matmul, better MXU N fill, one weight stream);
    # softmax scale folded into the Q columns so the kernel never rescales.
    wqkv = jnp.concatenate(
        [params["wq"] * scale, params["wk"], params["wv"]], axis=1).astype(bf16)
    bqkv = jnp.concatenate(
        [params["bq"] * scale, params["bk"], params["bv"]], axis=1).astype(f32)
    # Pre-split Wo per head so the kernel never lane-slices a weight.
    wo = params["wo"].astype(bf16).reshape(n_heads, d_feature, D)
    w1 = params["w1"].astype(bf16)
    w2 = params["w2"].astype(bf16)
    x_bf = x.astype(bf16)                  # matmul-only stream fed as bf16

    cparams = pltpu.CompilerParams(
        dimension_semantics=("parallel", "parallel"),
        vmem_limit_bytes=vmem_limit,
    )

    def run(weight_pipeline_mode):
        def const_spec(arr):
            idx = _const_index_map(arr.ndim)
            if weight_pipeline_mode is None:
                return pl.BlockSpec(arr.shape, idx)
            return pl.BlockSpec(arr.shape, idx,
                                pipeline_mode=weight_pipeline_mode)

        # ---- kernel 1: Q/K/V projected once for the whole sequence ---------
        qkv = pl.pallas_call(
            qkv_proj_kernel,
            out_shape=jax.ShapeDtypeStruct((B, S, 3 * Dh), bf16),
            grid=(B, S // tr),
            in_specs=[
                pl.BlockSpec((1, tr, D), lambda b, r: (b, r, 0)),
                const_spec(wqkv),
                const_spec(bqkv),
            ],
            out_specs=pl.BlockSpec((1, tr, 3 * Dh), lambda b, r: (b, r, 0)),
            compiler_params=cparams,
        )(x_bf, wqkv, bqkv)

        weights = (wo, params["bo"], params["g1"], params["be1"],
                   params["g2"], params["be2"],
                   w1, params["b1"], w2, params["b2"])

        kernel = functools.partial(
            encoder_block_kernel, n_heads=n_heads, d_feature=d_feature)

        # ---- kernel 2: attention + LN residuals + FFN per query tile --------
        # qkv is passed three times with different lane-block indices (Q tile,
        # resident K, resident V); K/V index maps ignore qi so their blocks are
        # DMA'd once per batch element. Batch stays the outer ("parallel")
        # axis so v7x's two TensorCores both get work while K/V reuse holds.
        return pl.pallas_call(
            kernel,
            out_shape=jax.ShapeDtypeStruct((B, S, D), x.dtype),
            grid=(B, S // tq),
            in_specs=[
                pl.BlockSpec((1, tq, D), lambda b, qi: (b, qi, 0)),   # residual rows (f32)
                pl.BlockSpec((1, tq, Dh), lambda b, qi: (b, qi, 0)),  # Q tile (bf16)
                pl.BlockSpec((1, S, Dh), lambda b, qi: (b, 0, 1)),    # K, full S, resident
                pl.BlockSpec((1, S, Dh), lambda b, qi: (b, 0, 2)),    # V, full S, resident
            ] + [const_spec(w) for w in weights],
            out_specs=pl.BlockSpec((1, tq, D), lambda b, qi: (b, qi, 0)),
            compiler_params=cparams,
        )(x, qkv, qkv, qkv, *weights)

    try:
        # Single-buffered resident weights (constant index maps): halves the
        # weight VMEM footprint.
        return run(pl.Buffered(1))
    except Exception:
        # Fallback if this jax/libtpu build rejects pipeline_mode=Buffered(1):
        # identical semantics with default 2-deep weight pipelining.
        return run(None)


def init_params(key, d_model, d_feature, d_ff, n_heads):
    ks = jax.random.split(key, 16)
    D = d_model
    Hd = n_heads * d_feature  # == d_model

    def w(k, din, dout):
        return 0.02 * jax.random.normal(k, (din, dout), jnp.float32)

    def b(k, dout):
        return 0.02 * jax.random.normal(k, (1, dout), jnp.float32)

    return dict(
        wq=w(ks[0], D, Hd), bq=b(ks[1], Hd),
        wk=w(ks[2], D, Hd), bk=b(ks[3], Hd),
        wv=w(ks[4], D, Hd), bv=b(ks[5], Hd),
        wo=w(ks[6], Hd, D), bo=b(ks[7], D),
        g1=1.0 + 0.1 * jax.random.normal(ks[8], (1, D), jnp.float32),
        be1=0.1 * jax.random.normal(ks[9], (1, D), jnp.float32),
        g2=1.0 + 0.1 * jax.random.normal(ks[10], (1, D), jnp.float32),
        be2=0.1 * jax.random.normal(ks[11], (1, D), jnp.float32),
        w1=w(ks[12], D, d_ff), b1=b(ks[13], d_ff),
        w2=w(ks[14], d_ff, D), b2=b(ks[15], D),
    )


def encoder_block_ref(x, p, *, n_heads, d_feature):
    """Pure-JAX reference mirroring the kernel's matmul precision
    (bf16 operands, f32 accumulation); LayerNorm/softmax/residuals in f32."""
    bf16, f32 = jnp.bfloat16, jnp.float32

    def mm(a, w):
        return jnp.dot(a.astype(bf16), w.astype(bf16), preferred_element_type=f32)

    B, S, D = x.shape
    q = mm(x, p["wq"]) + p["bq"]
    k = mm(x, p["wk"]) + p["bk"]
    v = mm(x, p["wv"]) + p["bv"]
    q = q.reshape(B, S, n_heads, d_feature).transpose(0, 2, 1, 3)
    k = k.reshape(B, S, n_heads, d_feature).transpose(0, 2, 1, 3)
    v = v.reshape(B, S, n_heads, d_feature).transpose(0, 2, 1, 3)
    s = jnp.einsum("bhqd,bhkd->bhqk",
                   (q / (d_feature ** 0.5)).astype(bf16), k.astype(bf16),
                   preferred_element_type=f32)
    pm = jax.nn.softmax(s, axis=-1)
    o = jnp.einsum("bhqk,bhkd->bhqd", pm.astype(bf16), v.astype(bf16),
                   preferred_element_type=f32)
    o = o.transpose(0, 2, 1, 3).reshape(B, S, -1)
    att = mm(o, p["wo"]) + p["bo"]

    def ln(y, g, bta, eps=1e-5):
        mu = jnp.mean(y, -1, keepdims=True)
        var = jnp.mean((y - mu) ** 2, -1, keepdims=True)
        return (y - mu) * jax.lax.rsqrt(var + eps) * g + bta

    x1 = x + ln(att, p["g1"], p["be1"])
    h1 = jax.nn.relu(mm(x1, p["w1"]) + p["b1"])
    pos = mm(h1, p["w2"]) + p["b2"]
    return x1 + ln(pos, p["g2"], p["be2"])


if __name__ == "__main__":
    # Small shapes consistent with the module defaults (d_model=512,
    # d_feature=64, d_ff=2048), scaled down but kept as multiples of 128 so
    # every load/store in the kernels is lane-dense.
    B, S = 2, 16
    d_model, d_feature, d_ff = 128, 32, 256
    n_heads = d_model // d_feature          # 4 heads

    key = jax.random.PRNGKey(0)
    kx, kp = jax.random.split(key)
    x = jax.random.normal(kx, (B, S, d_model), jnp.float32)
    params = init_params(kp, d_model, d_feature, d_ff, n_heads)

    out = encoder_block(x, params, n_heads=n_heads, d_feature=d_feature)
    out = jax.block_until_ready(out)

    ref = encoder_block_ref(x, params, n_heads=n_heads, d_feature=d_feature)
    assert out.shape == (B, S, d_model)
    max_err = float(jnp.max(jnp.abs(out - ref)))
    assert jnp.allclose(out, ref, atol=2e-2, rtol=2e-2), (
        f"mismatch vs reference (max |err| = {max_err})"
    )

    print("KERNEL_OK")
</pallas_src>

<mosaic_0001>
module attributes {stable_mosaic.version = 11 : i64} {
  func.func @qkv_proj_kernel(%arg0: i32, %arg1: i32, %arg2: memref<1x16x128xbf16, #tpu.memory_space<vmem>>, %arg3: memref<128x384xbf16, #tpu.memory_space<vmem>>, %arg4: memref<1x384xf32, #tpu.memory_space<vmem>>, %arg5: memref<1x16x384xbf16, #tpu.memory_space<vmem>>) attributes {dimension_semantics = [#tpu.dimension_semantics<parallel>, #tpu.dimension_semantics<parallel>], iteration_bounds = array<i64: 2, 1>, scalar_prefetch = 0 : i64, scratch_operands = 0 : i64, tpu.core_type = #tpu.core_type<tc>, window_params = [{transform_indices = @transform_0, window_bounds = array<i64: 1, 16, 128>}, {pipeline_mode = #tpu.pipeline_mode<synchronous>, transform_indices = @transform_1, window_bounds = array<i64: 128, 384>}, {pipeline_mode = #tpu.pipeline_mode<synchronous>, transform_indices = @transform_2, window_bounds = array<i64: 1, 384>}, {transform_indices = @transform_3, window_bounds = array<i64: 1, 16, 384>}]} {
    %c0 = arith.constant 0 : index
    %c0_0 = arith.constant 0 : index
    %c0_1 = arith.constant 0 : index
    %0 = vector.load %arg2[%c0, %c0_0, %c0_1] : memref<1x16x128xbf16, #tpu.memory_space<vmem>>, vector<1x16x128xbf16>
    %1 = vector.shape_cast %0 : vector<1x16x128xbf16> to vector<16x128xbf16>
    %c0_2 = arith.constant 0 : index
    %c0_3 = arith.constant 0 : index
    %2 = vector.load %arg3[%c0_2, %c0_3] : memref<128x384xbf16, #tpu.memory_space<vmem>>, vector<128x384xbf16>
    %cst = arith.constant dense<0.000000e+00> : vector<16x384xf32>
    %3 = tpu.matmul %1, %2, %cst {dimension_numbers = #tpu.dot_dimension_numbers<[1], [0], [0], [1], [0, 0, 1, 1], [], []>} : vector<16x128xbf16>, vector<128x384xbf16>, vector<16x384xf32> -> vector<16x384xf32>
    %c0_4 = arith.constant 0 : index
    %c0_5 = arith.constant 0 : index
    %4 = vector.load %arg4[%c0_4, %c0_5] : memref<1x384xf32, #tpu.memory_space<vmem>>, vector<1x384xf32>
    %5 = vector.broadcast %4 : vector<1x384xf32> to vector<16x384xf32>
    %6 = arith.addf %3, %5 : vector<16x384xf32>
    %7 = arith.truncf %6 : vector<16x384xf32> to vector<16x384xbf16>
    %c0_6 = arith.constant 0 : index
    %c0_7 = arith.constant 0 : index
    %c0_8 = arith.constant 0 : index
    %8 = vector.load %arg5[%c0_6, %c0_7, %c0_8] : memref<1x16x384xbf16, #tpu.memory_space<vmem>>, vector<1x16x384xbf16>
    %9 = vector.shape_cast %8 : vector<1x16x384xbf16> to vector<16x384xbf16>
    %10 = vector.shape_cast %7 : vector<16x384xbf16> to vector<1x16x384xbf16>
    tpu.vector_store %arg5[%c0_6, %c0_7, %c0_8], %10 {strides = array<i32>} : memref<1x16x384xbf16, #tpu.memory_space<vmem>>, vector<1x16x384xbf16>,
    return
  }
  func.func @transform_0(%arg0: i32, %arg1: i32) -> (i32, i32, i32) {
    %c0_i32 = arith.constant 0 : i32
    %c0_i32_0 = arith.constant 0 : i32
    return %arg0, %arg1, %c0_i32 : i32, i32, i32
  }
  func.func @transform_1(%arg0: i32, %arg1: i32) -> (i32, i32) {
    %c0_i32 = arith.constant 0 : i32
    %c0_i32_0 = arith.constant 0 : i32
    %c0_i32_1 = arith.constant 0 : i32
    return %c0_i32, %c0_i32_0 : i32, i32
  }
  func.func @transform_2(%arg0: i32, %arg1: i32) -> (i32, i32) {
    %c0_i32 = arith.constant 0 : i32
    %c0_i32_0 = arith.constant 0 : i32
    %c0_i32_1 = arith.constant 0 : i32
    return %c0_i32, %c0_i32_0 : i32, i32
  }
  func.func @transform_3(%arg0: i32, %arg1: i32) -> (i32, i32, i32) {
    %c0_i32 = arith.constant 0 : i32
    %c0_i32_0 = arith.constant 0 : i32
    return %arg0, %arg1, %c0_i32 : i32, i32, i32
  }
}

module attributes {stable_mosaic.version = 11 : i64} {
  func.func @qkv_proj_kernel(%arg0: i32, %arg1: i32, %arg2: memref<1x16x128xbf16, #tpu.memory_space<vmem>>, %arg3: memref<128x384xbf16, #tpu.memory_space<vmem>>, %arg4: memref<1x384xf32, #tpu.memory_space<vmem>>, %arg5: memref<1x16x384xbf16, #tpu.memory_space<vmem>>) attributes {dimension_semantics = [#tpu.dimension_semantics<parallel>, #tpu.dimension_semantics<parallel>], iteration_bounds = array<i64: 2, 1>, scalar_prefetch = 0 : i64, scratch_operands = 0 : i64, tpu.core_type = #tpu.core_type<tc>, window_params = [{transform_indices = @transform_0, window_bounds = array<i64: 1, 16, 128>}, {pipeline_mode = #tpu.pipeline_mode<synchronous>, transform_indices = @transform_1, window_bounds = array<i64: 128, 384>}, {pipeline_mode = #tpu.pipeline_mode<synchronous>, transform_indices = @transform_2, window_bounds = array<i64: 1, 384>}, {transform_indices = @transform_3, window_bounds = array<i64: 1, 16, 384>}]} {
    %c0 = arith.constant 0 : index
    %c0_0 = arith.constant 0 : index
    %c0_1 = arith.constant 0 : index
    %0 = vector.load %arg2[%c0, %c0_0, %c0_1] : memref<1x16x128xbf16, #tpu.memory_space<vmem>>, vector<1x16x128xbf16>
    %1 = vector.shape_cast %0 : vector<1x16x128xbf16> to vector<16x128xbf16>
    %c0_2 = arith.constant 0 : index
    %c0_3 = arith.constant 0 : index
    %2 = vector.load %arg3[%c0_2, %c0_3] : memref<128x384xbf16, #tpu.memory_space<vmem>>, vector<128x384xbf16>
    %cst = arith.constant dense<0.000000e+00> : vector<16x384xf32>
    %3 = tpu.matmul %1, %2, %cst {dimension_numbers = #tpu.dot_dimension_numbers<[1], [0], [0], [1], [0, 0, 1, 1], [], []>} : vector<16x128xbf16>, vector<128x384xbf16>, vector<16x384xf32> -> vector<16x384xf32>
    %c0_4 = arith.constant 0 : index
    %c0_5 = arith.constant 0 : index
    %4 = vector.load %arg4[%c0_4, %c0_5] : memref<1x384xf32, #tpu.memory_space<vmem>>, vector<1x384xf32>
    %5 = vector.broadcast %4 : vector<1x384xf32> to vector<16x384xf32>
    %6 = arith.addf %3, %5 : vector<16x384xf32>
    %7 = arith.truncf %6 : vector<16x384xf32> to vector<16x384xbf16>
    %c0_6 = arith.constant 0 : index
    %c0_7 = arith.constant 0 : index
    %c0_8 = arith.constant 0 : index
    %8 = vector.load %arg5[%c0_6, %c0_7, %c0_8] : memref<1x16x384xbf16, #tpu.memory_space<vmem>>, vector<1x16x384xbf16>
    %9 = vector.shape_cast %8 : vector<1x16x384xbf16> to vector<16x384xbf16>
    %10 = vector.shape_cast %7 : vector<16x384xbf16> to vector<1x16x384xbf16>
    tpu.vector_store %arg5[%c0_6, %c0_7, %c0_8], %10 {strides = array<i32>} : memref<1x16x384xbf16, #tpu.memory_space<vmem>>, vector<1x16x384xbf16>,
    return
  }
  func.func @transform_0(%arg0: i32, %arg1: i32) -> (i32, i32, i32) {
    %c0_i32 = arith.constant 0 : i32
    %c0_i32_0 = arith.constant 0 : i32
    return %arg0, %arg1, %c0_i32 : i32, i32, i32
  }
  func.func @transform_1(%arg0: i32, %arg1: i32) -> (i32, i32) {
    %c0_i32 = arith.constant 0 : i32
    %c0_i32_0 = arith.constant 0 : i32
    %c0_i32_1 = arith.constant 0 : i32
    return %c0_i32, %c0_i32_0 : i32, i32
  }
  func.func @transform_2(%arg0: i32, %arg1: i32) -> (i32, i32) {
    %c0_i32 = arith.constant 0 : i32
    %c0_i32_0 = arith.constant 0 : i32
    %c0_i32_1 = arith.constant 0 : i32
    return %c0_i32, %c0_i32_0 : i32, i32
  }
  func.func @transform_3(%arg0: i32, %arg1: i32) -> (i32, i32, i32) {
    %c0_i32 = arith.constant 0 : i32
    %c0_i32_0 = arith.constant 0 : i32
    return %arg0, %arg1, %c0_i32 : i32, i32, i32
  }
}

</mosaic_0001>

<bundles_post_ra>
// kernel: tpu_custom_call.1
= control target key start
LH: loop header
LB: loop body
LE: loop exit
PB: predicated region body
PF: predicated region fallthrough
CT: control target
= control target key end

     0   :  { %8 = vsyncpa [#allocation3], 0  ;;  %s1326_s0 = inlined_call_operand.hbm [shape: bf16[2,16,128], index: 0, kind: input, shape index: {}]   ;;  %s1327_s1 = inlined_call_operand.hbm [shape: bf16[128,384], index: 1, kind: input, shape index: {}]   ;;  %s1328_s2 = inlined_call_operand.hbm [shape: f32[1,384], index: 2, kind: input, shape index: {}]   ;;  %s1329_s3 = inlined_call_operand.hbm [shape: bf16[2,16,384], index: 3, kind: output, shape index: {}]  }
   0x1   :  { %10 = vsyncpa [#allocation3 + $0x1], 0 }
   0x2   :  { %11 = vsyncpa [#allocation6], 0 }
   0x3   :  { %12 = vsyncpa [#allocation4], 0 }
   0x4   :  { %14 = vsyncpa [#allocation4 + $0x1], 0  ;;  %s1066_s12 = smov 0   ;;  %s1068_s13 = smov 0  }
   0x5   :  { %s1070_s14 = smov 0   ;;  %s1072_s15 = smov 0  }
   0x6   :  { %s1074_s16 = smov 0   ;;  %s1076_s17 = smov 0  }
   0x7 LB: > { %s653_s18 = sadd.s32 4294967295, %s1031_s17   ;;  %s654_s19 = sadd.s32 4294967294, %s1031_s17   ;;  %s1031_s17 = sphi %s1076_s17, %s20_s17   ;;  %s1027_s16 = sphi %s1074_s16, %s1351_s16   ;;  %s1023_s15 = sphi %s1072_s15, %s1350_s15   ;;  %s1019_s14 = sphi %s1070_s14, %s1349_s14   ;;  %s1015_s13 = sphi %s1068_s13, %s1348_s13   ;;  %s1011_s12 = sphi %s1066_s12, %s1347_s12  }
   0x8   : > { %p54_p0 = scmp.ne.s32.totalorder %s1015_s13, %s1011_s12  ;;  %p1100_p1 = scmp.eq.s32.totalorder %s653_s18, 0 }
   0x9   : > { %p1104_p2 = scmp.eq.s32.totalorder %s653_s18, 1  ;;  %p128_p3 = scmp.eq.s32.totalorder %s654_s19, 1 }
   0xa   : > { %s1334_s20 = scalar_select %p1100_p1, 1, 0 }
   0xb   : > { %p1110_p4 = por %p1100_p1, %p54_p0  ;;  %p655_p5 = scmp.ge.s32.totalorder %s1031_s17, 1 }
   0xc   : > { %p1115_p6 = por %p128_p3, %p54_p0  ;;  %p135_p7 = scmp.lt.s32.totalorder %s1031_s17, 3 }
   0xd   : > { %s1336_s22 = scalar_select %p1110_p4, 1, 0 }
   0xe   : > { %s1337_s23 = scalar_select %p1115_p6, 1, 0 }
   0xf   : > { %p1120_p8 = pnand %p655_p5, %p135_p7  ;;  %s1033_s25 = smov [#allocation5]  }
  0x10   : > { %s147_s26 = sshll.u32 %s1033_s25, 4  ;;  %s1034_s28 = smov [#allocation7]   ;;  %s1124_s26 = int_to_ptr.vmem [resolvable:$true] %s147_s26 }
  0x11   : > { %p746_p9 = pneg %p1120_p8  ;;  %s161_s29 = sshll.u32 %s1034_s28, 4  ;;  %s1135_s29 = int_to_ptr.vmem [resolvable:$true] %s161_s29 }
  0x12   : > { %s859_s5 = scalar_lea.hbm %s1327_s1, 3072 }
  0x13   : > { %p1131_p11 = pnand %p746_p9, %p1100_p1  ;;  %p860_p12 = scmp.ne.s32.totalorder %s1327_s1, %s859_s5 }
  0x14   : > { %p866_p5 = scmp.lt.u32.totalorder %s859_s5, %s1327_s1 }
  0x15   : > { %p861_p13 = pneg %p1131_p11 }
  0x17   : > { %p862_p0 = pnand %p861_p13, %p860_p12 }
  0x19   : > { %p863_p3 = pneg %p862_p0 }
  0x1b   : > { %p868_p7 = pnand %p866_p5, %p863_p3 }
  0x1d   : > { %871 = shalt.err (!%p868_p7)
}
  0x1e   : > { %s872_s10 = scalar_lea.vmem %s1124_s26, 3072  ;;  %p880_p1 = scmp.lt.s32.totalorder %s1124_s26, %s1124_s26 }
  0x1f   : > { %p873_p9 = scmp.ne.s32.totalorder %s1124_s26, %s872_s10  ;;  %p881_p12 = scmp.lt.s32.totalorder %s872_s10, %s872_s10 }
  0x21   : > { %p875_p10 = pnand %p873_p9, %p861_p13  ;;  %p882_p0 = por %p881_p12, %p880_p1 }
  0x23   : > { %p876_p6 = pneg %p875_p10 }
  0x25   : > { %p883_p4 = pnand %p882_p0, %p876_p6 }
  0x27   : > { %886 = shalt.err (!%p883_p4)
}
  0x28   : > { %s1035_s11 = smov 192   ;;  %s1036_s18 = smov 12  }
  0x29   : > { %749 = dma.hbm_to_vmem [thread:$0]  (!%p1131_p11), %s1327_s1, 3072, %s1124_s26, [#allocation6], %s1035_s11, %s1035_s11, %s1036_s18  }
  0x2a   : > { %s887_s4 = scalar_lea.hbm %s1328_s2, 48 }
  0x2b   : > { %p888_p1 = scmp.ne.s32.totalorder %s1328_s2, %s887_s4  ;;  %p894_p10 = scmp.lt.u32.totalorder %s887_s4, %s1328_s2 }
  0x2d   : > { %p890_p4 = pnand %p888_p1, %p861_p13 }
  0x2f   : > { %p891_p6 = pneg %p890_p4 }
  0x31   : > { %p896_p3 = pnand %p894_p10, %p891_p6 }
  0x33   : > { %899 = shalt.err (!%p896_p3)
}
  0x34   : > { %s900_s26 = scalar_lea.vmem %s1135_s29, 48  ;;  %s907_s9 = scalar_lea.vmem %s1135_s29, 64 }
  0x35   : > { %p901_p5 = scmp.ne.s32.totalorder %s1135_s29, %s900_s26  ;;  %p908_p12 = scmp.lt.s32.totalorder %s1135_s29, %s1135_s29 }
  0x36   : > { %p909_p0 = scmp.lt.s32.totalorder %s907_s9, %s900_s26 }
  0x37   : > { %p903_p7 = pnand %p901_p5, %p861_p13 }
  0x38   : > { %p910_p1 = por %p909_p0, %p908_p12 }
  0x39   : > { %p904_p9 = pneg %p903_p7 }
  0x3b   : > { %p911_p4 = pnand %p910_p1, %p904_p9 }
  0x3d   : > { %914 = shalt.err (!%p911_p4)
}
  0x3e   : > { %752 = dma.hbm_to_vmem [thread:$0]  (!%p1131_p11), %s1328_s2, 48, %s1135_s29, [#allocation6]  }
  0x3f   : > { %s32_s18 = sadd.s32 1, %s1027_s16  ;;  %s41_s19 = sadd.s32 1, %s1019_s14 }
  0x40   : > { %p34_p13 = scmp.ge.s32.totalorder %s32_s18, 2  ;;  %p48_p6 = scmp.ne.s32.totalorder %s1019_s14, %s1015_s13 }
  0x41   : > { %p49_p10 = scmp.eq.s32.totalorder %s1031_s17, 0  ;;  %p763_p3 = scmp.lt.s32.totalorder %s1031_s17, 2 }
  0x42   : > { %s1353_s18 = smov (%p34_p13, %s32_s18), 0  ;;  %p1200_p7 = por %p1104_p2, %p48_p6 }
  0x43   : > { %p50_p5 = por %p49_p10, %p48_p6  ;;  %s36_s25 = ssub.s32 %s1027_s16, %s1353_s18 }
  0x44   : > { %s1340_s27 = scalar_select %p1200_p7, 1, 0 }
  0x45   : > { %s172_s28 = sand.u32 1, %s1019_s14   ;;  %p39_p9 = scmp.eq.s32.totalorder %s36_s25, 0 }
  0x46   : > { %s659_s29 = sshll.u32 %s172_s28, 3  ;;  %s698_s30 = sshll.u32 %s1027_s16, 7 }
  0x47   : > { %s1209_s4 = scalar_select %p39_p9, %s1019_s14, %s41_s19  }
  0x48   : > { %s1214_s7 = scalar_lea.hbm %s1326_s0, %s698_s30  ;;  %s176_s21 = scalar_lea.vmem [#allocation2], %s659_s29 }
  0x49   : > { %s185_s8 = sshll.u32 %s176_s21, 4  ;;  %p1218_p2 = pnand %p763_p3, %p50_p5  ;;  %s1222_s8 = int_to_ptr.vmem [resolvable:$true] %s185_s8 }
  0x4a   : > { %s1224_s9 = scalar_lea.sflag [#allocation3], %s172_s28  ;;  %s915_s10 = scalar_lea.hbm %s1214_s7, 128 }
  0x4b   : > { %p916_p11 = scmp.ne.s32.totalorder %s1214_s7, %s915_s10  ;;  %p917_p12 = pneg %p1218_p2 }
  0x4c   : > { %s920_s25 = scalar_lea.hbm %s1326_s0, 256  ;;  %p921_p4 = scmp.lt.u32.totalorder %s1214_s7, %s1326_s0 }
  0x4d   : > { %p918_p0 = pnand %p917_p12, %p916_p11  ;;  %p922_p13 = scmp.lt.u32.totalorder %s920_s25, %s915_s10 }
  0x4e   : > { %p924_p10 = scmp.lt.u32.totalorder %s915_s10, %s1214_s7 }
  0x4f   : > { %p919_p1 = pneg %p918_p0  ;;  %p923_p6 = por %p922_p13, %p921_p4 }
  0x51   : > { %p925_p3 = por %p924_p10, %p923_p6 }
  0x53   : > { %p926_p5 = pnand %p925_p3, %p919_p1 }
  0x55   : > { %929 = shalt.err (!%p926_p5)
}
  0x56   : > { %s930_s28 = scalar_lea.vmem %s1222_s8, 128  ;;  %s1037_s5 = smov [#allocation2]  }
  0x57   : > { %p931_p9 = scmp.ne.s32.totalorder %s1222_s8, %s930_s28  ;;  %s935_s6 = sshll.u32 %s1037_s5, 4  ;;  %s936_s6 = int_to_ptr.vmem [resolvable:$false] %s935_s6 }
  0x58   : > { %s937_s21 = scalar_lea.vmem %s936_s6, 256  ;;  %p938_p7 = scmp.lt.s32.totalorder %s1222_s8, %s936_s6 }
  0x59   : > { %p933_p11 = pnand %p931_p9, %p917_p12  ;;  %p939_p4 = scmp.lt.s32.totalorder %s937_s21, %s930_s28 }
  0x5b   : > { %p934_p0 = pneg %p933_p11  ;;  %p940_p13 = por %p939_p4, %p938_p7 }
  0x5d   : > { %p941_p6 = pnand %p940_p13, %p934_p0 }
  0x5f   : > { %944 = shalt.err (!%p941_p6)
}
  0x60   : > { %s1038_s10 = smov 64   ;;  %s1039_s11 = smov 4  }
  0x61   : > { %756 = dma.hbm_to_vmem [thread:$0]  (!%p1218_p2), %s1214_s7, 128, %s1222_s8, %s1224_s9, %s1038_s10, %s1038_s10, %s1039_s11  }
  0x62   : > { %197 = sbr.rel (%p1120_p8) target bundleno = 377 (0x179), region = 32  ;;  %s1255_s19 = sand.u32 (!%p1120_p8), 1, %s1015_s13  }
  0x63   : > { %s663_s25 = sshll.u32 (!%p1120_p8), %s1255_s19, 3  ;;  %s200_s29 = scalar_lea.sflag (!%p1120_p8), [#allocation3], %s1255_s19 }
  0x64   : > { %s1259_s30 = scalar_lea.vmem (!%p1120_p8), [#allocation2], %s663_s25  ;;  %p1342_p7 = scmp.ne.s32.totalorder (!%p1120_p8), %s1336_s22, 0 }
  0x69   : > { %998 = dma.done.wait (%p1342_p7), %s200_s29, 128  }
  0x6a   : > { %1000 = vsyncadd (%p1342_p7), %s200_s29, 4294967168  ;;  %p1343_p2 = scmp.ne.s32.totalorder %s1334_s20, 0 }
  0x6c   : > { %1002 = dma.done.wait (%p1343_p2), [#allocation6], 3120  }
  0x6d   : > { %1004 = vsyncadd (%p1343_p2), [#allocation6], 4294964176  ;;  %v1040_v0 = vmov 0.0   ;;  %vm1041_vm0 = vmmov 0   ;;  %v1042_v1 = vmov 0   ;;  %v858_v26 = vld [vmem:[%s1259_s30] sm:$0xff]   ;;  %v273_v27 = vlaneseq }
  0x6e   : > { %712 = vmatprep.subr.bf16.mxu1 %v1040_v0  ;;  %728 = vmatprep.mubr.msk.bf16.mxu1 %vm1041_vm0, %v1040_v0  ;;  %v826_v2 = vld [vmem:[#allocation5 + $0x4] ss:$12 sps:$4 sm:$0xff]   ;;  %v828_v3 = vld [vmem:[#allocation5 + $0x8] ss:$12 sps:$4 sm:$0xff]   ;;  %v829_v4 = vld [vmem:[#allocation5] ss:$12 sps:$4 sm:$0xff]  }
  0x6f   : > { %454 = vmatprep.mubr.bf16.mxu0 %v1042_v1  ;;  %422 = vmatprep.subr.bf16.mxu0 %v826_v2  ;;  %v830_v5 = vld [vmem:[#allocation5 + $0x1c] ss:$12 sps:$4 sm:$0xff]   ;;  %v832_v6 = vld [vmem:[#allocation5 + $0x20] ss:$12 sps:$4 sm:$0xff]   ;;  %v833_v7 = vld [vmem:[#allocation5 + $0x18] ss:$12 sps:$4 sm:$0xff]  }
  0x70   : > { %713 = vmatpush3.bf16.msra.mxu1 %v828_v3  ;;  %423 = vmatpush1.bf16.msra.mxu0 %v829_v4  ;;  %v834_v8 = vld [vmem:[#allocation5 + $0x34] ss:$12 sps:$4 sm:$0xff]   ;;  %v836_v9 = vld [vmem:[#allocation5 + $0x38] ss:$12 sps:$4 sm:$0xff]   ;;  %v837_v10 = vld [vmem:[#allocation5 + $0x30] ss:$12 sps:$4 sm:$0xff]  }
  0x71   : > { %714 = vmatprep.subr.bf16.mxu1 %v1040_v0  ;;  %424 = vmatprep.subr.bf16.mxu0 %v830_v5  ;;  %v838_v11 = vld [vmem:[#allocation5 + $0x4c] ss:$12 sps:$4 sm:$0xff]   ;;  %v840_v12 = vld [vmem:[#allocation5 + $0x50] ss:$12 sps:$4 sm:$0xff]   ;;  %v841_v13 = vld [vmem:[#allocation5 + $0x48] ss:$12 sps:$4 sm:$0xff]  }
  0x72   : > { %v842_v14 = vld [vmem:[#allocation5 + $0x64] ss:$12 sps:$4 sm:$0xff]   ;;  %v844_v15 = vld [vmem:[#allocation5 + $0x68] ss:$12 sps:$4 sm:$0xff]   ;;  %v845_v16 = vld [vmem:[#allocation5 + $0x60] ss:$12 sps:$4 sm:$0xff]  }
  0x73   : > { %v846_v17 = vld [vmem:[#allocation5 + $0x7c] ss:$12 sps:$4 sm:$0xff]   ;;  %v848_v18 = vld [vmem:[#allocation5 + $0x80] ss:$12 sps:$4 sm:$0xff]   ;;  %v849_v19 = vld [vmem:[#allocation5 + $0x78] ss:$12 sps:$4 sm:$0xff]  }
  0x74   : > { %715 = vmatpush3.bf16.msra.mxu1 %v832_v6  ;;  %425 = vmatpush1.bf16.msra.mxu0 %v833_v7  ;;  %v850_v20 = vld [vmem:[#allocation5 + $0x94] ss:$12 sps:$4 sm:$0xff]   ;;  %v852_v21 = vld [vmem:[#allocation5 + $0x98] ss:$12 sps:$4 sm:$0xff]   ;;  %v853_v22 = vld [vmem:[#allocation5 + $0x90] ss:$12 sps:$4 sm:$0xff]  }
  0x75   : > { %716 = vmatprep.subr.bf16.mxu1 %v1040_v0  ;;  %426 = vmatprep.subr.bf16.mxu0 %v834_v8  ;;  %v854_v23 = vld [vmem:[#allocation5 + $0xac] ss:$12 sps:$4 sm:$0xff]   ;;  %v856_v24 = vld [vmem:[#allocation5 + $0xb0] ss:$12 sps:$4 sm:$0xff]   ;;  %v857_v25 = vld [vmem:[#allocation5 + $0xa8] ss:$12 sps:$4 sm:$0xff]  }
  0x76   : > { %v274_v28 = vshrl.u32 %v273_v27, 7  ;;  %v271_v30 = vld [vmem:[#allocation7] sm:$0x7]  ;;  %s732_s20 = smul.u32 24, %s1255_s19  ;;  %s531_s9 = scalar_lea.sflag [#allocation4], %s1255_s19 }
  0x77   : > { %s733_s7 = smul.u32 384, %s1023_s15  ;;  %p1344_p12 = scmp.ne.s32.totalorder %s1340_s27, 0 }
  0x78   : > { %717 = vmatpush3.bf16.msra.mxu1 %v836_v9  ;;  %427 = vmatpush1.bf16.msra.mxu0 %v837_v10  ;;  %v283_v29 = vsub.s32 2, %v274_v28  ;;  %v275_v31 = vsub.s32 0, %v274_v28  ;;  %v279_v32 = vsub.s32 1, %v274_v28  ;;  %s233_s22 = scalar_lea.vmem [#allocation8], %s732_s20  ;;  %s1043_s5 = smov [#allocation8]  }
  0x79   : > { %718 = vmatprep.subr.bf16.mxu1 %v1040_v0  ;;  %428 = vmatprep.subr.bf16.mxu0 %v838_v11  ;;  %s547_s24 = sshll.u32 %s233_s22, 4  ;;  %s1277_s26 = scalar_lea.hbm %s1329_s3, %s733_s7  ;;  %s1272_s24 = int_to_ptr.vmem [resolvable:$true] %s547_s24 }
  0x7a   : > { %v284_v33 = vrot.slane %v271_v30, %v283_v29  ;;  %v276_v34 = vrot.slane %v271_v30, %v275_v31  ;;  %v280_v35 = vrot.slane %v271_v30, %v279_v32  ;;  %s945_s28 = scalar_lea.vmem %s1272_s24, 384  ;;  %s949_s6 = sshll.u32 %s1043_s5, 4  ;;  %s950_s6 = int_to_ptr.vmem [resolvable:$false] %s949_s6 }
  0x7b   : > { %p946_p8 = scmp.ne.s32.totalorder %s1272_s24, %s945_s28  ;;  %s951_s21 = scalar_lea.vmem %s950_s6, 768 }
  0x7c   : > { %719 = vmatpush3.bf16.msra.mxu1 %v840_v12  ;;  %429 = vmatpush1.bf16.msra.mxu0 %v841_v13  ;;  %p952_p3 = scmp.lt.s32.totalorder %s1272_s24, %s950_s6  ;;  %p953_p5 = scmp.lt.s32.totalorder %s951_s21, %s945_s28 }
  0x7d   : > { %720 = vmatprep.subr.bf16.mxu1 %v1040_v0  ;;  %430 = vmatprep.subr.bf16.mxu0 %v842_v14  ;;  %p947_p1 = pnand %p946_p8, %p1344_p12 }
  0x7e   : > { %p954_p9 = por %p953_p5, %p952_p3 }
  0x7f   : > { %p948_p10 = pneg %p947_p1 }
  0x80   : > { %721 = vmatpush3.bf16.msra.mxu1 %v844_v15  ;;  %431 = vmatpush1.bf16.msra.mxu0 %v845_v16 }
  0x81   : > { %722 = vmatprep.subr.bf16.mxu1 %v1040_v0  ;;  %432 = vmatprep.subr.bf16.mxu0 %v846_v17  ;;  %p955_p11 = pnand %p954_p9, %p948_p10 }
  0x84   : > { %723 = vmatpush3.bf16.msra.mxu1 %v848_v18  ;;  %433 = vmatpush1.bf16.msra.mxu0 %v849_v19 }
  0x85   : > { %724 = vmatprep.subr.bf16.mxu1 %v1040_v0  ;;  %434 = vmatprep.subr.bf16.mxu0 %v850_v20 }
  0x88   : > { %725 = vmatpush3.bf16.msra.mxu1 %v852_v21  ;;  %435 = vmatpush1.bf16.msra.mxu0 %v853_v22 }
  0x89   : > { %726 = vmatprep.subr.bf16.mxu1 %v1040_v0  ;;  %436 = vmatprep.subr.bf16.mxu0 %v854_v23 }
  0x8c   : > { %727 = vmatpush3.bf16.msra.mxu1 %v856_v24  ;;  %437 = vmatpush1.bf16.msra.mxu0 %v857_v25 }
  0x8f   : > { %729 = vmatmul.mubr.bf16.vlgmr.msra.gmra.mrb[0].mxu1 %v858_v26  ;;  %455 = vmatmul.mubr.bf16.vlgmr.msra.gmra.mrb[0].mxu0 %v858_v26 }
 0x162   : > { %v499_v36 = vpop.f32.mrb[0].mxu1  ;;  %v456_v38 = vpop.f32.mrb[0].mxu0 }
 0x163   : > { %v500_v37 = vadd.f32 %v499_v36, %v284_v33  ;;  %v730_v39 = vpop.f32.mrb[1].mxu1  ;;  %v457_v40 = vadd.f32 %v456_v38, %v276_v34  ;;  %v458_v41 = vpop.f32.mrb[1].mxu0 }
 0x164   : > { %v502_v42 = vpop.f32.mrb[2].mxu1  ;;  %v459_v44 = vadd.f32 %v458_v41, %v280_v35  ;;  %v460_v46 = vpop.f32.mrb[2].mxu0 }
 0x165   : > { %v700_v43 = vpack.c.bf16 %v500_v37, %v500_v37  ;;  %v503_v45 = vadd.f32 %v502_v42, %v284_v33  ;;  %v731_v47 = vpop.f32.mrb[3].mxu1  ;;  %v461_v48 = vadd.f32 %v460_v46, %v276_v34  ;;  %v462_v49 = vpop.f32.mrb[3].mxu0 }
 0x166   : > { %v699_v50 = vpack.c.bf16 %v459_v44, %v457_v40  ;;  %v463_v52 = vadd.f32 %v462_v49, %v280_v35 }
 0x167   : > { %527 = vst [vmem:[%s233_s22 + $0x8] sm:$0xf] %v700_v43  ;;  %v702_v51 = vpack.c.bf16 %v503_v45, %v503_v45 }
 0x168   : > { %526 = vst [vmem:[%s233_s22] sm:$0xff] %v699_v50  ;;  %v701_v53 = vpack.c.bf16 %v463_v52, %v461_v48 }
 0x169   : > { %529 = vst [vmem:[%s233_s22 + $0x14] sm:$0xf] %v702_v51 }
 0x16a   : > { %528 = vst [vmem:[%s233_s22 + $0xc] sm:$0xff] %v701_v53 }
 0x16b   : > { %958 = shalt.err (!%p955_p11)
}
 0x16c   : > { %s959_s10 = scalar_lea.hbm %s1277_s26, 384  ;;  %s963_s29 = scalar_lea.hbm %s1329_s3, 768 }
 0x16d   : > { %p960_p0 = scmp.ne.s32.totalorder %s1277_s26, %s959_s10  ;;  %p964_p6 = scmp.lt.u32.totalorder %s1277_s26, %s1329_s3 }
 0x16e   : > { %p965_p7 = scmp.lt.u32.totalorder %s963_s29, %s959_s10  ;;  %p967_p8 = scmp.lt.u32.totalorder %s959_s10, %s1277_s26 }
 0x16f   : > { %p961_p4 = pnand %p960_p0, %p1344_p12 }
 0x170   : > { %p966_p2 = por %p965_p7, %p964_p6 }
 0x171   : > { %p962_p13 = pneg %p961_p4 }
 0x172   : > { %p968_p1 = por %p967_p8, %p966_p2 }
 0x174   : > { %p969_p10 = pnand %p968_p1, %p962_p13 }
 0x176   : > { %972 = shalt.err (!%p969_p10)
}
 0x177   : > { %s1044_s22 = smov 192   ;;  %s1045_s7 = smov 12  }
 0x178   : > { %744 = dma.vmem_to_hbm [thread:$0]  (%p1344_p12), %s1272_s24, 384, %s1277_s26, %s531_s9, %s1044_s22, %s1044_s22, %s1045_s7  }
 0x179 PF: > { %s562_s8 = sand.u32 1, %s1011_s12   ;;  %p1345_p3 = scmp.ne.s32.totalorder %s1337_s23, 0 }
 0x17a   : > { %p1346_p5 = scmp.ge.s32.totalorder %s1031_s17, 2  ;;  %s563_s15 = scalar_lea.sflag [#allocation4], %s562_s8 }
 0x17c   : > { %p758_p9 = pnand %p1346_p5, %p1345_p3 }
 0x17e   : > { %1006 = dma.done.wait (!%p758_p9), %s563_s15, 384  }
 0x17f   : > { %1008 = vsyncadd (!%p758_p9), %s563_s15, 4294966912  ;;  %s20_s17 = sadd.s32 1, %s1031_s17   ;;  %s1347_s12 = smov %s1015_s13 }
 0x180   : > { %p17_p11 = scmp.ge.s32.totalorder %s20_s17, 4   ;;  %s1348_s13 = smov %s1019_s14 }
 0x181   : > { %s1349_s14 = smov %s1209_s4  ;;  %s1350_s15 = smov %s1027_s16 }
 0x182   : > { %s1351_s16 = smov %s1353_s18  ;;  %19 = sbr.rel (!%p17_p11) target bundleno = 7 (0x7), region = 85 }
 0x189   :  { %568 = vsyncpa [#allocation3], 1 }
 0x18a   :  { %570 = vsyncpa [#allocation3 + $0x1], 1 }
 0x18b   :  { %571 = vsyncpa [#allocation6], 1 }
 0x18c   :  { %572 = vsyncpa [#allocation4], 1 }
 0x18d   :  { %574 = vsyncpa [#allocation4 + $0x1], 1 }

// kernel: tpu_custom_call.1
= control target key start
LH: loop header
LB: loop body
LE: loop exit
PB: predicated region body
PF: predicated region fallthrough
CT: control target
= control target key end

     0   :  { %8 = vsyncpa [#allocation3], 0  ;;  %s1326_s0 = inlined_call_operand.hbm [shape: bf16[2,16,128], index: 0, kind: input, shape index: {}]   ;;  %s1327_s1 = inlined_call_operand.hbm [shape: bf16[128,384], index: 1, kind: input, shape index: {}]   ;;  %s1328_s2 = inlined_call_operand.hbm [shape: f32[1,384], index: 2, kind: input, shape index: {}]   ;;  %s1329_s3 = inlined_call_operand.hbm [shape: bf16[2,16,384], index: 3, kind: output, shape index: {}]  }
   0x1   :  { %10 = vsyncpa [#allocation3 + $0x1], 0 }
   0x2   :  { %11 = vsyncpa [#allocation6], 0 }
   0x3   :  { %12 = vsyncpa [#allocation4], 0 }
   0x4   :  { %14 = vsyncpa [#allocation4 + $0x1], 0  ;;  %s1066_s12 = smov 0   ;;  %s1068_s13 = smov 0  }
   0x5   :  { %s1070_s14 = smov 0   ;;  %s1072_s15 = smov 0  }
   0x6   :  { %s1074_s16 = smov 0   ;;  %s1076_s17 = smov 0  }
   0x7 LB: > { %s653_s18 = sadd.s32 4294967295, %s1031_s17   ;;  %s654_s19 = sadd.s32 4294967294, %s1031_s17   ;;  %s1031_s17 = sphi %s1076_s17, %s20_s17   ;;  %s1027_s16 = sphi %s1074_s16, %s1351_s16   ;;  %s1023_s15 = sphi %s1072_s15, %s1350_s15   ;;  %s1019_s14 = sphi %s1070_s14, %s1349_s14   ;;  %s1015_s13 = sphi %s1068_s13, %s1348_s13   ;;  %s1011_s12 = sphi %s1066_s12, %s1347_s12  }
   0x8   : > { %p54_p0 = scmp.ne.s32.totalorder %s1015_s13, %s1011_s12  ;;  %p1100_p1 = scmp.eq.s32.totalorder %s653_s18, 0 }
   0x9   : > { %p1104_p2 = scmp.eq.s32.totalorder %s653_s18, 1  ;;  %p128_p3 = scmp.eq.s32.totalorder %s654_s19, 1 }
   0xa   : > { %s1334_s20 = scalar_select %p1100_p1, 1, 0 }
   0xb   : > { %p1110_p4 = por %p1100_p1, %p54_p0  ;;  %p655_p5 = scmp.ge.s32.totalorder %s1031_s17, 1 }
   0xc   : > { %p1115_p6 = por %p128_p3, %p54_p0  ;;  %p135_p7 = scmp.lt.s32.totalorder %s1031_s17, 3 }
   0xd   : > { %s1336_s22 = scalar_select %p1110_p4, 1, 0 }
   0xe   : > { %s1337_s23 = scalar_select %p1115_p6, 1, 0 }
   0xf   : > { %p1120_p8 = pnand %p655_p5, %p135_p7  ;;  %s1033_s25 = smov [#allocation5]  }
  0x10   : > { %s147_s26 = sshll.u32 %s1033_s25, 4  ;;  %s1034_s28 = smov [#allocation7]   ;;  %s1124_s26 = int_to_ptr.vmem [resolvable:$true] %s147_s26 }
  0x11   : > { %p746_p9 = pneg %p1120_p8  ;;  %s161_s29 = sshll.u32 %s1034_s28, 4  ;;  %s1135_s29 = int_to_ptr.vmem [resolvable:$true] %s161_s29 }
  0x12   : > { %s859_s5 = scalar_lea.hbm %s1327_s1, 3072 }
  0x13   : > { %p1131_p11 = pnand %p746_p9, %p1100_p1  ;;  %p860_p12 = scmp.ne.s32.totalorder %s1327_s1, %s859_s5 }
  0x14   : > { %p866_p5 = scmp.lt.u32.totalorder %s859_s5, %s1327_s1 }
  0x15   : > { %p861_p13 = pneg %p1131_p11 }
  0x17   : > { %p862_p0 = pnand %p861_p13, %p860_p12 }
  0x19   : > { %p863_p3 = pneg %p862_p0 }
  0x1b   : > { %p868_p7 = pnand %p866_p5, %p863_p3 }
  0x1d   : > { %871 = shalt.err (!%p868_p7)
}
  0x1e   : > { %s872_s10 = scalar_lea.vmem %s1124_s26, 3072  ;;  %p880_p1 = scmp.lt.s32.totalorder %s1124_s26, %s1124_s26 }
  0x1f   : > { %p873_p9 = scmp.ne.s32.totalorder %s1124_s26, %s872_s10  ;;  %p881_p12 = scmp.lt.s32.totalorder %s872_s10, %s872_s10 }
  0x21   : > { %p875_p10 = pnand %p873_p9, %p861_p13  ;;  %p882_p0 = por %p881_p12, %p880_p1 }
  0x23   : > { %p876_p6 = pneg %p875_p10 }
  0x25   : > { %p883_p4 = pnand %p882_p0, %p876_p6 }
  0x27   : > { %886 = shalt.err (!%p883_p4)
}
  0x28   : > { %s1035_s11 = smov 192   ;;  %s1036_s18 = smov 12  }
  0x29   : > { %749 = dma.hbm_to_vmem [thread:$0]  (!%p1131_p11), %s1327_s1, 3072, %s1124_s26, [#allocation6], %s1035_s11, %s1035_s11, %s1036_s18  }
  0x2a   : > { %s887_s4 = scalar_lea.hbm %s1328_s2, 48 }
  0x2b   : > { %p888_p1 = scmp.ne.s32.totalorder %s1328_s2, %s887_s4  ;;  %p894_p10 = scmp.lt.u32.totalorder %s887_s4, %s1328_s2 }
  0x2d   : > { %p890_p4 = pnand %p888_p1, %p861_p13 }
  0x2f   : > { %p891_p6 = pneg %p890_p4 }
  0x31   : > { %p896_p3 = pnand %p894_p10, %p891_p6 }
  0x33   : > { %899 = shalt.err (!%p896_p3)
}
  0x34   : > { %s900_s26 = scalar_lea.vmem %s1135_s29, 48  ;;  %s907_s9 = scalar_lea.vmem %s1135_s29, 64 }
  0x35   : > { %p901_p5 = scmp.ne.s32.totalorder %s1135_s29, %s900_s26  ;;  %p908_p12 = scmp.lt.s32.totalorder %s1135_s29, %s1135_s29 }
  0x36   : > { %p909_p0 = scmp.lt.s32.totalorder %s907_s9, %s900_s26 }
  0x37   : > { %p903_p7 = pnand %p901_p5, %p861_p13 }
  0x38   : > { %p910_p1 = por %p909_p0, %p908_p12 }
  0x39   : > { %p904_p9 = pneg %p903_p7 }
  0x3b   : > { %p911_p4 = pnand %p910_p1, %p904_p9 }
  0x3d   : > { %914 = shalt.err (!%p911_p4)
}
  0x3e   : > { %752 = dma.hbm_to_vmem [thread:$0]  (!%p1131_p11), %s1328_s2, 48, %s1135_s29, [#allocation6]  }
  0x3f   : > { %s32_s18 = sadd.s32 1, %s1027_s16  ;;  %s41_s19 = sadd.s32 1, %s1019_s14 }
  0x40   : > { %p34_p13 = scmp.ge.s32.totalorder %s32_s18, 2  ;;  %p48_p6 = scmp.ne.s32.totalorder %s1019_s14, %s1015_s13 }
  0x41   : > { %p49_p10 = scmp.eq.s32.totalorder %s1031_s17, 0  ;;  %p763_p3 = scmp.lt.s32.totalorder %s1031_s17, 2 }
  0x42   : > { %s1353_s18 = smov (%p34_p13, %s32_s18), 0  ;;  %p1200_p7 = por %p1104_p2, %p48_p6 }
  0x43   : > { %p50_p5 = por %p49_p10, %p48_p6  ;;  %s36_s25 = ssub.s32 %s1027_s16, %s1353_s18 }
  0x44   : > { %s1340_s27 = scalar_select %p1200_p7, 1, 0 }
  0x45   : > { %s172_s28 = sand.u32 1, %s1019_s14   ;;  %p39_p9 = scmp.eq.s32.totalorder %s36_s25, 0 }
  0x46   : > { %s659_s29 = sshll.u32 %s172_s28, 3  ;;  %s698_s30 = sshll.u32 %s1027_s16, 7 }
  0x47   : > { %s1209_s4 = scalar_select %p39_p9, %s1019_s14, %s41_s19  }
  0x48   : > { %s1214_s7 = scalar_lea.hbm %s1326_s0, %s698_s30  ;;  %s176_s21 = scalar_lea.vmem [#allocation2], %s659_s29 }
  0x49   : > { %s185_s8 = sshll.u32 %s176_s21, 4  ;;  %p1218_p2 = pnand %p763_p3, %p50_p5  ;;  %s1222_s8 = int_to_ptr.vmem [resolvable:$true] %s185_s8 }
  0x4a   : > { %s1224_s9 = scalar_lea.sflag [#allocation3], %s172_s28  ;;  %s915_s10 = scalar_lea.hbm %s1214_s7, 128 }
  0x4b   : > { %p916_p11 = scmp.ne.s32.totalorder %s1214_s7, %s915_s10  ;;  %p917_p12 = pneg %p1218_p2 }
  0x4c   : > { %s920_s25 = scalar_lea.hbm %s1326_s0, 256  ;;  %p921_p4 = scmp.lt.u32.totalorder %s1214_s7, %s1326_s0 }
  0x4d   : > { %p918_p0 = pnand %p917_p12, %p916_p11  ;;  %p922_p13 = scmp.lt.u32.totalorder %s920_s25, %s915_s10 }
  0x4e   : > { %p924_p10 = scmp.lt.u32.totalorder %s915_s10, %s1214_s7 }
  0x4f   : > { %p919_p1 = pneg %p918_p0  ;;  %p923_p6 = por %p922_p13, %p921_p4 }
  0x51   : > { %p925_p3 = por %p924_p10, %p923_p6 }
  0x53   : > { %p926_p5 = pnand %p925_p3, %p919_p1 }
  0x55   : > { %929 = shalt.err (!%p926_p5)
}
  0x56   : > { %s930_s28 = scalar_lea.vmem %s1222_s8, 128  ;;  %s1037_s5 = smov [#allocation2]  }
  0x57   : > { %p931_p9 = scmp.ne.s32.totalorder %s1222_s8, %s930_s28  ;;  %s935_s6 = sshll.u32 %s1037_s5, 4  ;;  %s936_s6 = int_to_ptr.vmem [resolvable:$false] %s935_s6 }
  0x58   : > { %s937_s21 = scalar_lea.vmem %s936_s6, 256  ;;  %p938_p7 = scmp.lt.s32.totalorder %s1222_s8, %s936_s6 }
  0x59   : > { %p933_p11 = pnand %p931_p9, %p917_p12  ;;  %p939_p4 = scmp.lt.s32.totalorder %s937_s21, %s930_s28 }
  0x5b   : > { %p934_p0 = pneg %p933_p11  ;;  %p940_p13 = por %p939_p4, %p938_p7 }
  0x5d   : > { %p941_p6 = pnand %p940_p13, %p934_p0 }
  0x5f   : > { %944 = shalt.err (!%p941_p6)
}
  0x60   : > { %s1038_s10 = smov 64   ;;  %s1039_s11 = smov 4  }
  0x61   : > { %756 = dma.hbm_to_vmem [thread:$0]  (!%p1218_p2), %s1214_s7, 128, %s1222_s8, %s1224_s9, %s1038_s10, %s1038_s10, %s1039_s11  }
  0x62   : > { %197 = sbr.rel (%p1120_p8) target bundleno = 377 (0x179), region = 32  ;;  %s1255_s19 = sand.u32 (!%p1120_p8), 1, %s1015_s13  }
  0x63   : > { %s663_s25 = sshll.u32 (!%p1120_p8), %s1255_s19, 3  ;;  %s200_s29 = scalar_lea.sflag (!%p1120_p8), [#allocation3], %s1255_s19 }
  0x64   : > { %s1259_s30 = scalar_lea.vmem (!%p1120_p8), [#allocation2], %s663_s25  ;;  %p1342_p7 = scmp.ne.s32.totalorder (!%p1120_p8), %s1336_s22, 0 }
  0x69   : > { %998 = dma.done.wait (%p1342_p7), %s200_s29, 128  }
  0x6a   : > { %1000 = vsyncadd (%p1342_p7), %s200_s29, 4294967168  ;;  %p1343_p2 = scmp.ne.s32.totalorder %s1334_s20, 0 }
  0x6c   : > { %1002 = dma.done.wait (%p1343_p2), [#allocation6], 3120  }
  0x6d   : > { %1004 = vsyncadd (%p1343_p2), [#allocation6], 4294964176  ;;  %v1040_v0 = vmov 0.0   ;;  %vm1041_vm0 = vmmov 0   ;;  %v1042_v1 = vmov 0   ;;  %v858_v26 = vld [vmem:[%s1259_s30] sm:$0xff]   ;;  %v273_v27 = vlaneseq }
  0x6e   : > { %712 = vmatprep.subr.bf16.mxu1 %v1040_v0  ;;  %728 = vmatprep.mubr.msk.bf16.mxu1 %vm1041_vm0, %v1040_v0  ;;  %v826_v2 = vld [vmem:[#allocation5 + $0x4] ss:$12 sps:$4 sm:$0xff]   ;;  %v828_v3 = vld [vmem:[#allocation5 + $0x8] ss:$12 sps:$4 sm:$0xff]   ;;  %v829_v4 = vld [vmem:[#allocation5] ss:$12 sps:$4 sm:$0xff]  }
  0x6f   : > { %454 = vmatprep.mubr.bf16.mxu0 %v1042_v1  ;;  %422 = vmatprep.subr.bf16.mxu0 %v826_v2  ;;  %v830_v5 = vld [vmem:[#allocation5 + $0x1c] ss:$12 sps:$4 sm:$0xff]   ;;  %v832_v6 = vld [vmem:[#allocation5 + $0x20] ss:$12 sps:$4 sm:$0xff]   ;;  %v833_v7 = vld [vmem:[#allocation5 + $0x18] ss:$12 sps:$4 sm:$0xff]  }
  0x70   : > { %713 = vmatpush3.bf16.msra.mxu1 %v828_v3  ;;  %423 = vmatpush1.bf16.msra.mxu0 %v829_v4  ;;  %v834_v8 = vld [vmem:[#allocation5 + $0x34] ss:$12 sps:$4 sm:$0xff]   ;;  %v836_v9 = vld [vmem:[#allocation5 + $0x38] ss:$12 sps:$4 sm:$0xff]   ;;  %v837_v10 = vld [vmem:[#allocation5 + $0x30] ss:$12 sps:$4 sm:$0xff]  }
  0x71   : > { %714 = vmatprep.subr.bf16.mxu1 %v1040_v0  ;;  %424 = vmatprep.subr.bf16.mxu0 %v830_v5  ;;  %v838_v11 = vld [vmem:[#allocation5 + $0x4c] ss:$12 sps:$4 sm:$0xff]   ;;  %v840_v12 = vld [vmem:[#allocation5 + $0x50] ss:$12 sps:$4 sm:$0xff]   ;;  %v841_v13 = vld [vmem:[#allocation5 + $0x48] ss:$12 sps:$4 sm:$0xff]  }
  0x72   : > { %v842_v14 = vld [vmem:[#allocation5 + $0x64] ss:$12 sps:$4 sm:$0xff]   ;;  %v844_v15 = vld [vmem:[#allocation5 + $0x68] ss:$12 sps:$4 sm:$0xff]   ;;  %v845_v16 = vld [vmem:[#allocation5 + $0x60] ss:$12 sps:$4 sm:$0xff]  }
  0x73   : > { %v846_v17 = vld [vmem:[#allocation5 + $0x7c] ss:$12 sps:$4 sm:$0xff]   ;;  %v848_v18 = vld [vmem:[#allocation5 + $0x80] ss:$12 sps:$4 sm:$0xff]   ;;  %v849_v19 = vld [vmem:[#allocation5 + $0x78] ss:$12 sps:$4 sm:$0xff]  }
  0x74   : > { %715 = vmatpush3.bf16.msra.mxu1 %v832_v6  ;;  %425 = vmatpush1.bf16.msra.mxu0 %v833_v7  ;;  %v850_v20 = vld [vmem:[#allocation5 + $0x94] ss:$12 sps:$4 sm:$0xff]   ;;  %v852_v21 = vld [vmem:[#allocation5 + $0x98] ss:$12 sps:$4 sm:$0xff]   ;;  %v853_v22 = vld [vmem:[#allocation5 + $0x90] ss:$12 sps:$4 sm:$0xff]  }
  0x75   : > { %716 = vmatprep.subr.bf16.mxu1 %v1040_v0  ;;  %426 = vmatprep.subr.bf16.mxu0 %v834_v8  ;;  %v854_v23 = vld [vmem:[#allocation5 + $0xac] ss:$12 sps:$4 sm:$0xff]   ;;  %v856_v24 = vld [vmem:[#allocation5 + $0xb0] ss:$12 sps:$4 sm:$0xff]   ;;  %v857_v25 = vld [vmem:[#allocation5 + $0xa8] ss:$12 sps:$4 sm:$0xff]  }
  0x76   : > { %v274_v28 = vshrl.u32 %v273_v27, 7  ;;  %v271_v30 = vld [vmem:[#allocation7] sm:$0x7]  ;;  %s732_s20 = smul.u32 24, %s1255_s19  ;;  %s531_s9 = scalar_lea.sflag [#allocation4], %s1255_s19 }
  0x77   : > { %s733_s7 = smul.u32 384, %s1023_s15  ;;  %p1344_p12 = scmp.ne.s32.totalorder %s1340_s27, 0 }
  0x78   : > { %717 = vmatpush3.bf16.msra.mxu1 %v836_v9  ;;  %427 = vmatpush1.bf16.msra.mxu0 %v837_v10  ;;  %v283_v29 = vsub.s32 2, %v274_v28  ;;  %v275_v31 = vsub.s32 0, %v274_v28  ;;  %v279_v32 = vsub.s32 1, %v274_v28  ;;  %s233_s22 = scalar_lea.vmem [#allocation8], %s732_s20  ;;  %s1043_s5 = smov [#allocation8]  }
  0x79   : > { %718 = vmatprep.subr.bf16.mxu1 %v1040_v0  ;;  %428 = vmatprep.subr.bf16.mxu0 %v838_v11  ;;  %s547_s24 = sshll.u32 %s233_s22, 4  ;;  %s1277_s26 = scalar_lea.hbm %s1329_s3, %s733_s7  ;;  %s1272_s24 = int_to_ptr.vmem [resolvable:$true] %s547_s24 }
  0x7a   : > { %v284_v33 = vrot.slane %v271_v30, %v283_v29  ;;  %v276_v34 = vrot.slane %v271_v30, %v275_v31  ;;  %v280_v35 = vrot.slane %v271_v30, %v279_v32  ;;  %s945_s28 = scalar_lea.vmem %s1272_s24, 384  ;;  %s949_s6 = sshll.u32 %s1043_s5, 4  ;;  %s950_s6 = int_to_ptr.vmem [resolvable:$false] %s949_s6 }
  0x7b   : > { %p946_p8 = scmp.ne.s32.totalorder %s1272_s24, %s945_s28  ;;  %s951_s21 = scalar_lea.vmem %s950_s6, 768 }
  0x7c   : > { %719 = vmatpush3.bf16.msra.mxu1 %v840_v12  ;;  %429 = vmatpush1.bf16.msra.mxu0 %v841_v13  ;;  %p952_p3 = scmp.lt.s32.totalorder %s1272_s24, %s950_s6  ;;  %p953_p5 = scmp.lt.s32.totalorder %s951_s21, %s945_s28 }
  0x7d   : > { %720 = vmatprep.subr.bf16.mxu1 %v1040_v0  ;;  %430 = vmatprep.subr.bf16.mxu0 %v842_v14  ;;  %p947_p1 = pnand %p946_p8, %p1344_p12 }
  0x7e   : > { %p954_p9 = por %p953_p5, %p952_p3 }
  0x7f   : > { %p948_p10 = pneg %p947_p1 }
  0x80   : > { %721 = vmatpush3.bf16.msra.mxu1 %v844_v15  ;;  %431 = vmatpush1.bf16.msra.mxu0 %v845_v16 }
  0x81   : > { %722 = vmatprep.subr.bf16.mxu1 %v1040_v0  ;;  %432 = vmatprep.subr.bf16.mxu0 %v846_v17  ;;  %p955_p11 = pnand %p954_p9, %p948_p10 }
  0x84   : > { %723 = vmatpush3.bf16.msra.mxu1 %v848_v18  ;;  %433 = vmatpush1.bf16.msra.mxu0 %v849_v19 }
  0x85   : > { %724 = vmatprep.subr.bf16.mxu1 %v1040_v0  ;;  %434 = vmatprep.subr.bf16.mxu0 %v850_v20 }
  0x88   : > { %725 = vmatpush3.bf16.msra.mxu1 %v852_v21  ;;  %435 = vmatpush1.bf16.msra.mxu0 %v853_v22 }
  0x89   : > { %726 = vmatprep.subr.bf16.mxu1 %v1040_v0  ;;  %436 = vmatprep.subr.bf16.mxu0 %v854_v23 }
  0x8c   : > { %727 = vmatpush3.bf16.msra.mxu1 %v856_v24  ;;  %437 = vmatpush1.bf16.msra.mxu0 %v857_v25 }
  0x8f   : > { %729 = vmatmul.mubr.bf16.vlgmr.msra.gmra.mrb[0].mxu1 %v858_v26  ;;  %455 = vmatmul.mubr.bf16.vlgmr.msra.gmra.mrb[0].mxu0 %v858_v26 }
 0x162   : > { %v499_v36 = vpop.f32.mrb[0].mxu1  ;;  %v456_v38 = vpop.f32.mrb[0].mxu0 }
 0x163   : > { %v500_v37 = vadd.f32 %v499_v36, %v284_v33  ;;  %v730_v39 = vpop.f32.mrb[1].mxu1  ;;  %v457_v40 = vadd.f32 %v456_v38, %v276_v34  ;;  %v458_v41 = vpop.f32.mrb[1].mxu0 }
 0x164   : > { %v502_v42 = vpop.f32.mrb[2].mxu1  ;;  %v459_v44 = vadd.f32 %v458_v41, %v280_v35  ;;  %v460_v46 = vpop.f32.mrb[2].mxu0 }
 0x165   : > { %v700_v43 = vpack.c.bf16 %v500_v37, %v500_v37  ;;  %v503_v45 = vadd.f32 %v502_v42, %v284_v33  ;;  %v731_v47 = vpop.f32.mrb[3].mxu1  ;;  %v461_v48 = vadd.f32 %v460_v46, %v276_v34  ;;  %v462_v49 = vpop.f32.mrb[3].mxu0 }
 0x166   : > { %v699_v50 = vpack.c.bf16 %v459_v44, %v457_v40  ;;  %v463_v52 = vadd.f32 %v462_v49, %v280_v35 }
 0x167   : > { %527 = vst [vmem:[%s233_s22 + $0x8] sm:$0xf] %v700_v43  ;;  %v702_v51 = vpack.c.bf16 %v503_v45, %v503_v45 }
 0x168   : > { %526 = vst [vmem:[%s233_s22] sm:$0xff] %v699_v50  ;;  %v701_v53 = vpack.c.bf16 %v463_v52, %v461_v48 }
 0x169   : > { %529 = vst [vmem:[%s233_s22 + $0x14] sm:$0xf] %v702_v51 }
 0x16a   : > { %528 = vst [vmem:[%s233_s22 + $0xc] sm:$0xff] %v701_v53 }
 0x16b   : > { %958 = shalt.err (!%p955_p11)
}
 0x16c   : > { %s959_s10 = scalar_lea.hbm %s1277_s26, 384  ;;  %s963_s29 = scalar_lea.hbm %s1329_s3, 768 }
 0x16d   : > { %p960_p0 = scmp.ne.s32.totalorder %s1277_s26, %s959_s10  ;;  %p964_p6 = scmp.lt.u32.totalorder %s1277_s26, %s1329_s3 }
 0x16e   : > { %p965_p7 = scmp.lt.u32.totalorder %s963_s29, %s959_s10  ;;  %p967_p8 = scmp.lt.u32.totalorder %s959_s10, %s1277_s26 }
 0x16f   : > { %p961_p4 = pnand %p960_p0, %p1344_p12 }
 0x170   : > { %p966_p2 = por %p965_p7, %p964_p6 }
 0x171   : > { %p962_p13 = pneg %p961_p4 }
 0x172   : > { %p968_p1 = por %p967_p8, %p966_p2 }
 0x174   : > { %p969_p10 = pnand %p968_p1, %p962_p13 }
 0x176   : > { %972 = shalt.err (!%p969_p10)
}
 0x177   : > { %s1044_s22 = smov 192   ;;  %s1045_s7 = smov 12  }
 0x178   : > { %744 = dma.vmem_to_hbm [thread:$0]  (%p1344_p12), %s1272_s24, 384, %s1277_s26, %s531_s9, %s1044_s22, %s1044_s22, %s1045_s7  }
 0x179 PF: > { %s562_s8 = sand.u32 1, %s1011_s12   ;;  %p1345_p3 = scmp.ne.s32.totalorder %s1337_s23, 0 }
 0x17a   : > { %p1346_p5 = scmp.ge.s32.totalorder %s1031_s17, 2  ;;  %s563_s15 = scalar_lea.sflag [#allocation4], %s562_s8 }
 0x17c   : > { %p758_p9 = pnand %p1346_p5, %p1345_p3 }
 0x17e   : > { %1006 = dma.done.wait (!%p758_p9), %s563_s15, 384  }
 0x17f   : > { %1008 = vsyncadd (!%p758_p9), %s563_s15, 4294966912  ;;  %s20_s17 = sadd.s32 1, %s1031_s17   ;;  %s1347_s12 = smov %s1015_s13 }
 0x180   : > { %p17_p11 = scmp.ge.s32.totalorder %s20_s17, 4   ;;  %s1348_s13 = smov %s1019_s14 }
 0x181   : > { %s1349_s14 = smov %s1209_s4  ;;  %s1350_s15 = smov %s1027_s16 }
 0x182   : > { %s1351_s16 = smov %s1353_s18  ;;  %19 = sbr.rel (!%p17_p11) target bundleno = 7 (0x7), region = 85 }
 0x189   :  { %568 = vsyncpa [#allocation3], 1 }
 0x18a   :  { %570 = vsyncpa [#allocation3 + $0x1], 1 }
 0x18b   :  { %571 = vsyncpa [#allocation6], 1 }
 0x18c   :  { %572 = vsyncpa [#allocation4], 1 }
 0x18d   :  { %574 = vsyncpa [#allocation4 + $0x1], 1 }

</bundles_post_ra>
